<compile_context>
chip_gen: v7x
topology: tpu7x:2x2x1
jax: 0.10.0
libtpu: 0.0.40
codegen_flags: <defaults>
</compile_context>

<pallas_src>
import math

import jax
import jax.numpy as jnp
from jax import lax
from jax.experimental import pallas as pl
from jax.experimental.pallas import tpu as pltpu


def encoder_lstm_kernel(emb_ref, hc0_ref, w_ref, b_ref,
                        out_ref, hcn_ref, xw_ref):
    """One T-chunk of a fused 1-layer LSTM.

    emb_ref: (Tc*B, E)  bf16  embedded inputs for this chunk (time-major flat)
    hc0_ref: (2, B, H)  f32   packed initial (h0, c0)      [VMEM-resident]
    w_ref:   (E+H, 4H)  bf16  packed [W_ih; W_hh], gates i,f,g,o [resident]
    b_ref:   (1, 4H)    f32   b_ih + b_hh                  [resident]
    out_ref: (Tc, B, H) f32   per-timestep hidden states for this chunk
    hcn_ref: (2, B, H)  f32   resident (h, c) state; final value is (h_n, c_n)
    xw_ref:  (Tc*B, 4H) f32   scratch: per-chunk input projections
    """
    E = emb_ref.shape[1]
    Tc, B, H = out_ref.shape

    # Seed the resident (h, c) state from (h0, c0) on the first chunk only.
    @pl.when(pl.program_id(0) == 0)
    def _():
        hcn_ref[...] = hc0_ref[...]

    # Input projection for the whole chunk in ONE MXU pass (bf16 in, f32 acc).
    xw_ref[...] = (jnp.dot(emb_ref[...], w_ref[:E, :],
                           preferred_element_type=jnp.float32)
                   + b_ref[...])

    w_hh = w_ref[E:, :]                                   # (H, 4H) bf16, VMEM

    # Lane mask so the activations run once over the full (B, 4H) tile.
    # Gate order i, f, g, o: tanh on lanes [2H, 3H), sigmoid elsewhere written
    # divide-free as 0.5*tanh(0.5*x)+0.5  ->  a single EUP tanh per step.
    lane = lax.broadcasted_iota(jnp.int32, (B, 4 * H), 1)
    is_g = jnp.logical_and(lane >= 2 * H, lane < 3 * H)

    def step(t, carry):
        h_b, c = carry                                    # h_b: bf16, c: f32
        row0 = pl.multiple_of(t * B, B)
        gates = (xw_ref[pl.ds(row0, B), :]
                 + jnp.dot(h_b, w_hh,
                           preferred_element_type=jnp.float32))   # (B,4H) f32
        th = jnp.tanh(jnp.where(is_g, gates, 0.5 * gates))
        act = jnp.where(is_g, th, 0.5 * th + 0.5)
        i_g = act[:, 0 * H:1 * H]
        f_g = act[:, 1 * H:2 * H]
        g_g = act[:, 2 * H:3 * H]
        o_g = act[:, 3 * H:4 * H]
        c_new = f_g * c + i_g * g_g
        h_new = o_g * jnp.tanh(c_new)
        out_ref[t] = h_new
        # Produce the bf16 copy for the next matmul here (off the next step's
        # critical path prefix).
        return (h_new.astype(jnp.bfloat16), c_new)

    _, c_fin = lax.fori_loop(
        0, Tc, step,
        (hcn_ref[0].astype(jnp.bfloat16), hcn_ref[1]),
        unroll=True)                                      # unroll capped at Tc

    hcn_ref[0] = out_ref[Tc - 1]                          # final h (f32)
    hcn_ref[1] = c_fin


def encoder_rnn_forward(params, x, hidden=None, *, chunk=4):
    """x: (B, T) int32 token ids. hidden: optional (h0, c0), each (1, B, H).
    Returns (output (T, B, H), (h_n, c_n) each (1, B, H)) like the module."""
    B, T = x.shape
    emb_table = params["embedding"]                       # (V, E) bf16
    w = params["w_packed"]                                # (E+H, 4H) bf16
    b = params["b_fused"]                                 # (1, 4H) f32
    E = emb_table.shape[1]
    H = w.shape[1] // 4

    if hidden is None:
        hidden = (jnp.zeros((1, B, H), jnp.float32),
                  jnp.zeros((1, B, H), jnp.float32))
    h0, c0 = hidden

    Tc = math.gcd(T, chunk)                               # static chunk length
    n_chunks = T // Tc

    # Embedding gather lands directly in the time-major flat (T*B, E) layout;
    # PyTorch's transpose(embedded, 0, 1) never becomes an HBM relayout.
    # Eval-mode dropout is the identity.
    idx = x.T.reshape(-1)                                 # (T*B,)
    emb = emb_table[idx]                                  # (T*B, E) bf16
    hc0 = jnp.concatenate([h0, c0], axis=0).astype(jnp.float32)   # (2, B, H)

    cost = pl.CostEstimate(
        flops=2 * T * B * (E + H) * 4 * H + 12 * T * B * H,
        transcendentals=5 * T * B * H,
        bytes_accessed=(T * B * E * 2 + (E + H) * 4 * H * 2 + 4 * H * 4
                        + 2 * (2 * B * H * 4) + T * B * H * 4),
    )

    grid_spec = pltpu.PrefetchScalarGridSpec(
        num_scalar_prefetch=0,
        grid=(n_chunks,),
        in_specs=[
            pl.BlockSpec((Tc * B, E), lambda t: (t, 0)),          # streamed
            pl.BlockSpec((2, B, H), lambda t: (0, 0, 0)),         # resident
            pl.BlockSpec((E + H, 4 * H), lambda t: (0, 0)),       # resident
            pl.BlockSpec((1, 4 * H), lambda t: (0, 0)),           # resident
        ],
        out_specs=(
            pl.BlockSpec((Tc, B, H), lambda t: (t, 0, 0)),        # streamed
            pl.BlockSpec((2, B, H), lambda t: (0, 0, 0)),         # resident
        ),
        scratch_shapes=[pltpu.VMEM((Tc * B, 4 * H), jnp.float32)],
    )

    out, hcn = pl.pallas_call(
        encoder_lstm_kernel,
        out_shape=(jax.ShapeDtypeStruct((T, B, H), jnp.float32),
                   jax.ShapeDtypeStruct((2, B, H), jnp.float32)),
        grid_spec=grid_spec,
        compiler_params=pltpu.CompilerParams(
            dimension_semantics=("arbitrary",),       # serial recurrence over T
            vmem_limit_bytes=64 * 1024 * 1024),
        input_output_aliases={1: 1},                  # (h0,c0) buf -> (h_n,c_n)
        cost_estimate=cost,
    )(emb, hc0, w, b)

    return out, (hcn[0:1], hcn[1:2])


def encoder_rnn_reference(params, x, hidden):
    """Pure-JAX reference with the SAME numerics as the kernel (bf16 matmul
    inputs, bf16-rounded recurrent h feedback, f32 gate math)."""
    E = params["embedding"].shape[1]
    emb = params["embedding"][x.T].astype(jnp.float32)            # (T, B, E)
    w = params["w_packed"].astype(jnp.float32)
    w_ih, w_hh = w[:E], w[E:]
    b = params["b_fused"].astype(jnp.float32)
    h, c = hidden[0][0], hidden[1][0]
    H = h.shape[1]
    outs = []
    for t in range(x.shape[1]):
        h_b = h.astype(jnp.bfloat16).astype(jnp.float32)
        gates = emb[t] @ w_ih + h_b @ w_hh + b
        i_g = jax.nn.sigmoid(gates[:, :H])
        f_g = jax.nn.sigmoid(gates[:, H:2 * H])
        g_g = jnp.tanh(gates[:, 2 * H:3 * H])
        o_g = jax.nn.sigmoid(gates[:, 3 * H:])
        c = f_g * c + i_g * g_g
        h = o_g * jnp.tanh(c)
        outs.append(h)
    return jnp.stack(outs, axis=0), (h[None], c[None])


def init_params(key, vocab_size, embedding_size, hidden_size):
    """PyTorch-like LSTM(E, H, 1) params, pre-packed once for the kernel:
    bf16 embedding table, bf16 [W_ih; W_hh] (stored (in, out), gate order
    i, f, g, o), and b_ih + b_hh pre-summed in f32."""
    E, H, V = embedding_size, hidden_size, vocab_size
    ks = jax.random.split(key, 5)
    bound = 1.0 / jnp.sqrt(jnp.float32(H))

    def unif(k, shape):
        return jax.random.uniform(k, shape, jnp.float32, -bound, bound)

    w_ih = unif(ks[1], (E, 4 * H))
    w_hh = unif(ks[2], (H, 4 * H))
    b_ih = unif(ks[3], (4 * H,))
    b_hh = unif(ks[4], (4 * H,))
    return {
        "embedding": jax.random.normal(ks[0], (V, E),
                                       jnp.float32).astype(jnp.bfloat16),
        "w_packed": jnp.concatenate([w_ih, w_hh], axis=0).astype(jnp.bfloat16),
        "b_fused": (b_ih + b_hh).reshape(1, 4 * H).astype(jnp.float32),
    }


if __name__ == "__main__":
    # batch, seq_len, embed, hidden, vocab.  H=128 keeps the gate tile (B, 4H)
    # lane-dense (4H = 512) and the out store unmasked (last dim 128).
    B, T, E, H, V = 8, 8, 32, 128, 50

    key = jax.random.PRNGKey(0)
    kp, kx = jax.random.split(key)
    params = init_params(kp, V, E, H)
    x = jax.random.randint(kx, (B, T), 0, V, jnp.int32)   # (batch, seq_len)
    h0 = jnp.zeros((1, B, H), jnp.float32)                # initHidden
    c0 = jnp.zeros((1, B, H), jnp.float32)

    fwd = jax.jit(encoder_rnn_forward)
    out, (h_n, c_n) = fwd(params, x, (h0, c0))
    jax.block_until_ready((out, h_n, c_n))

    assert out.shape == (T, B, H)
    assert h_n.shape == (1, B, H) and c_n.shape == (1, B, H)

    ref_out, (ref_h, ref_c) = encoder_rnn_reference(params, x, (h0, c0))
    assert jnp.allclose(out, ref_out, atol=2e-2, rtol=2e-2)
    assert jnp.allclose(h_n, ref_h, atol=2e-2, rtol=2e-2)
    assert jnp.allclose(c_n, ref_c, atol=2e-2, rtol=2e-2)

    print("KERNEL_OK")
</pallas_src>

<mosaic_0001>
module attributes {stable_mosaic.version = 11 : i64} {
  func.func @encoder_lstm_kernel(%arg0: i32, %arg1: memref<32x32xbf16, #tpu.memory_space<vmem>>, %arg2: memref<2x8x128xf32, #tpu.memory_space<vmem>>, %arg3: memref<160x512xbf16, #tpu.memory_space<vmem>>, %arg4: memref<1x512xf32, #tpu.memory_space<vmem>>, %arg5: memref<4x8x128xf32, #tpu.memory_space<vmem>>, %arg6: memref<2x8x128xf32, #tpu.memory_space<vmem>>, %arg7: memref<32x512xf32, #tpu.memory_space<vmem>>) attributes {dimension_semantics = [#tpu.dimension_semantics<arbitrary>], iteration_bounds = array<i64: 2>, scalar_prefetch = 0 : i64, scratch_operands = 1 : i64, tpu.core_type = #tpu.core_type<tc>, window_params = [{transform_indices = @transform_0, window_bounds = array<i64: 32, 32>}, {pipeline_mode = #tpu.pipeline_mode<synchronous>, transform_indices = @transform_1, window_bounds = array<i64: 2, 8, 128>}, {pipeline_mode = #tpu.pipeline_mode<synchronous>, transform_indices = @transform_2, window_bounds = array<i64: 160, 512>}, {pipeline_mode = #tpu.pipeline_mode<synchronous>, transform_indices = @transform_3, window_bounds = array<i64: 1, 512>}, {transform_indices = @transform_4, window_bounds = array<i64: 4, 8, 128>}, {pipeline_mode = #tpu.pipeline_mode<synchronous>, transform_indices = @transform_5, window_bounds = array<i64: 2, 8, 128>}]} {
    %c0_i32 = arith.constant 0 : i32
    %0 = arith.cmpi eq, %arg0, %c0_i32 : i32
    %1 = arith.extui %0 : i1 to i32
    %c0_i32_0 = arith.constant 0 : i32
    %2 = arith.cmpi ne, %1, %c0_i32_0 : i32
    scf.if %2 {
      %c0_54 = arith.constant 0 : index
      %c0_55 = arith.constant 0 : index
      %c0_56 = arith.constant 0 : index
      %146 = vector.load %arg2[%c0_54, %c0_55, %c0_56] : memref<2x8x128xf32, #tpu.memory_space<vmem>>, vector<2x8x128xf32>
      %c0_57 = arith.constant 0 : index
      %c0_58 = arith.constant 0 : index
      %c0_59 = arith.constant 0 : index
      %147 = vector.load %arg6[%c0_57, %c0_58, %c0_59] : memref<2x8x128xf32, #tpu.memory_space<vmem>>, vector<2x8x128xf32>
      tpu.vector_store %arg6[%c0_57, %c0_58, %c0_59], %146 {strides = array<i32>} : memref<2x8x128xf32, #tpu.memory_space<vmem>>, vector<2x8x128xf32>,
    } else {
    }
    %c0 = arith.constant 0 : index
    %c0_1 = arith.constant 0 : index
    %3 = vector.load %arg1[%c0, %c0_1] : memref<32x32xbf16, #tpu.memory_space<vmem>>, vector<32x32xbf16>
    %c0_2 = arith.constant 0 : index
    %c0_3 = arith.constant 0 : index
    %4 = vector.load %arg3[%c0_2, %c0_3] : memref<160x512xbf16, #tpu.memory_space<vmem>>, vector<32x512xbf16>
    %cst = arith.constant dense<0.000000e+00> : vector<32x512xf32>
    %5 = tpu.matmul %3, %4, %cst {dimension_numbers = #tpu.dot_dimension_numbers<[1], [0], [0], [1], [0, 0, 1, 1], [], []>} : vector<32x32xbf16>, vector<32x512xbf16>, vector<32x512xf32> -> vector<32x512xf32>
    %c0_4 = arith.constant 0 : index
    %c0_5 = arith.constant 0 : index
    %6 = vector.load %arg4[%c0_4, %c0_5] : memref<1x512xf32, #tpu.memory_space<vmem>>, vector<1x512xf32>
    %7 = vector.broadcast %6 : vector<1x512xf32> to vector<32x512xf32>
    %8 = arith.addf %5, %7 : vector<32x512xf32>
    %c0_6 = arith.constant 0 : index
    %c0_7 = arith.constant 0 : index
    %9 = vector.load %arg7[%c0_6, %c0_7] : memref<32x512xf32, #tpu.memory_space<vmem>>, vector<32x512xf32>
    tpu.vector_store %arg7[%c0_6, %c0_7], %8 {strides = array<i32>} : memref<32x512xf32, #tpu.memory_space<vmem>>, vector<32x512xf32>,
    %c32 = arith.constant 32 : index
    %c0_8 = arith.constant 0 : index
    %10 = vector.load %arg3[%c32, %c0_8] : memref<160x512xbf16, #tpu.memory_space<vmem>>, vector<128x512xbf16>
    %11 = tpu.iota {dimensions = array<i32: 1>} : vector<8x512xi32>
    %c256_i32 = arith.constant 256 : i32
    %12 = vector.broadcast %c256_i32 : i32 to vector<8x512xi32>
    %13 = arith.cmpi sge, %11, %12 : vector<8x512xi32>
    %c384_i32 = arith.constant 384 : i32
    %14 = vector.broadcast %c384_i32 : i32 to vector<8x512xi32>
    %15 = arith.cmpi slt, %11, %14 : vector<8x512xi32>
    %16 = arith.andi %13, %15 : vector<8x512xi1>
    %c0_9 = arith.constant 0 : index
    %c0_10 = arith.constant 0 : index
    %c0_11 = arith.constant 0 : index
    %17 = vector.load %arg6[%c0_9, %c0_10, %c0_11] : memref<2x8x128xf32, #tpu.memory_space<vmem>>, vector<1x8x128xf32>
    %18 = vector.shape_cast %17 : vector<1x8x128xf32> to vector<8x128xf32>
    %19 = arith.truncf %18 : vector<8x128xf32> to vector<8x128xbf16>
    %c1 = arith.constant 1 : index
    %c0_12 = arith.constant 0 : index
    %c0_13 = arith.constant 0 : index
    %20 = vector.load %arg6[%c1, %c0_12, %c0_13] : memref<2x8x128xf32, #tpu.memory_space<vmem>>, vector<1x8x128xf32>
    %21 = vector.shape_cast %20 : vector<1x8x128xf32> to vector<8x128xf32>
    %c0_i32_14 = arith.constant 0 : i32
    %c8_i32 = arith.constant 8 : i32
    %22 = arith.muli %c0_i32_14, %c8_i32 : i32
    %23 = tpu.assume_multiple %22, 8 : i32
    %24 = arith.index_cast %23 : i32 to index
    %c0_15 = arith.constant 0 : index
    %25 = vector.load %arg7[%24, %c0_15] : memref<32x512xf32, #tpu.memory_space<vmem>>, vector<8x512xf32>
    %cst_16 = arith.constant dense<0.000000e+00> : vector<8x512xf32>
    %26 = tpu.matmul %19, %10, %cst_16 {dimension_numbers = #tpu.dot_dimension_numbers<[1], [0], [0], [1], [0, 0, 1, 1], [], []>} : vector<8x128xbf16>, vector<128x512xbf16>, vector<8x512xf32> -> vector<8x512xf32>
    %27 = arith.addf %25, %26 : vector<8x512xf32>
    %cst_17 = arith.constant 5.000000e-01 : f32
    %28 = vector.broadcast %cst_17 : f32 to vector<8x512xf32>
    %29 = arith.mulf %28, %27 : vector<8x512xf32>
    %30 = arith.select %16, %27, %29 : vector<8x512xi1>, vector<8x512xf32>
    %31 = math.tanh %30 : vector<8x512xf32>
    %cst_18 = arith.constant 5.000000e-01 : f32
    %32 = vector.broadcast %cst_18 : f32 to vector<8x512xf32>
    %33 = arith.mulf %32, %31 : vector<8x512xf32>
    %cst_19 = arith.constant 5.000000e-01 : f32
    %34 = vector.broadcast %cst_19 : f32 to vector<8x512xf32>
    %35 = arith.addf %33, %34 : vector<8x512xf32>
    %36 = arith.select %16, %31, %35 : vector<8x512xi1>, vector<8x512xf32>
    %37 = vector.extract_strided_slice %36 {offsets = [0, 0], sizes = [8, 128], strides = [1, 1]} : vector<8x512xf32> to vector<8x128xf32>
    %38 = vector.extract_strided_slice %36 {offsets = [0, 128], sizes = [8, 128], strides = [1, 1]} : vector<8x512xf32> to vector<8x128xf32>
    %39 = vector.extract_strided_slice %36 {offsets = [0, 256], sizes = [8, 128], strides = [1, 1]} : vector<8x512xf32> to vector<8x128xf32>
    %40 = vector.extract_strided_slice %36 {offsets = [0, 384], sizes = [8, 128], strides = [1, 1]} : vector<8x512xf32> to vector<8x128xf32>
    %41 = arith.mulf %38, %21 : vector<8x128xf32>
    %42 = arith.mulf %37, %39 : vector<8x128xf32>
    %43 = arith.addf %41, %42 : vector<8x128xf32>
    %44 = math.tanh %43 : vector<8x128xf32>
    %45 = arith.mulf %40, %44 : vector<8x128xf32>
    %46 = arith.index_cast %c0_i32_14 : i32 to index
    %c0_20 = arith.constant 0 : index
    %c0_21 = arith.constant 0 : index
    %47 = vector.load %arg5[%46, %c0_20, %c0_21] : memref<4x8x128xf32, #tpu.memory_space<vmem>>, vector<1x8x128xf32>
    %48 = vector.shape_cast %47 : vector<1x8x128xf32> to vector<8x128xf32>
    %49 = vector.shape_cast %45 : vector<8x128xf32> to vector<1x8x128xf32>
    tpu.vector_store %arg5[%46, %c0_20, %c0_21], %49 {strides = array<i32>} : memref<4x8x128xf32, #tpu.memory_space<vmem>>, vector<1x8x128xf32>,
    %50 = arith.truncf %45 : vector<8x128xf32> to vector<8x128xbf16>
    %c1_i32 = arith.constant 1 : i32
    %c8_i32_22 = arith.constant 8 : i32
    %51 = arith.muli %c1_i32, %c8_i32_22 : i32
    %52 = tpu.assume_multiple %51, 8 : i32
    %53 = arith.index_cast %52 : i32 to index
    %c0_23 = arith.constant 0 : index
    %54 = vector.load %arg7[%53, %c0_23] : memref<32x512xf32, #tpu.memory_space<vmem>>, vector<8x512xf32>
    %cst_24 = arith.constant dense<0.000000e+00> : vector<8x512xf32>
    %55 = tpu.matmul %50, %10, %cst_24 {dimension_numbers = #tpu.dot_dimension_numbers<[1], [0], [0], [1], [0, 0, 1, 1], [], []>} : vector<8x128xbf16>, vector<128x512xbf16>, vector<8x512xf32> -> vector<8x512xf32>
    %56 = arith.addf %54, %55 : vector<8x512xf32>
    %cst_25 = arith.constant 5.000000e-01 : f32
    %57 = vector.broadcast %cst_25 : f32 to vector<8x512xf32>
    %58 = arith.mulf %57, %56 : vector<8x512xf32>
    %59 = arith.select %16, %56, %58 : vector<8x512xi1>, vector<8x512xf32>
    %60 = math.tanh %59 : vector<8x512xf32>
    %cst_26 = arith.constant 5.000000e-01 : f32
    %61 = vector.broadcast %cst_26 : f32 to vector<8x512xf32>
    %62 = arith.mulf %61, %60 : vector<8x512xf32>
    %cst_27 = arith.constant 5.000000e-01 : f32
    %63 = vector.broadcast %cst_27 : f32 to vector<8x512xf32>
    %64 = arith.addf %62, %63 : vector<8x512xf32>
    %65 = arith.select %16, %60, %64 : vector<8x512xi1>, vector<8x512xf32>
    %66 = vector.extract_strided_slice %65 {offsets = [0, 0], sizes = [8, 128], strides = [1, 1]} : vector<8x512xf32> to vector<8x128xf32>
    %67 = vector.extract_strided_slice %65 {offsets = [0, 128], sizes = [8, 128], strides = [1, 1]} : vector<8x512xf32> to vector<8x128xf32>
    %68 = vector.extract_strided_slice %65 {offsets = [0, 256], sizes = [8, 128], strides = [1, 1]} : vector<8x512xf32> to vector<8x128xf32>
    %69 = vector.extract_strided_slice %65 {offsets = [0, 384], sizes = [8, 128], strides = [1, 1]} : vector<8x512xf32> to vector<8x128xf32>
    %70 = arith.mulf %67, %43 : vector<8x128xf32>
    %71 = arith.mulf %66, %68 : vector<8x128xf32>
    %72 = arith.addf %70, %71 : vector<8x128xf32>
    %73 = math.tanh %72 : vector<8x128xf32>
    %74 = arith.mulf %69, %73 : vector<8x128xf32>
    %75 = arith.index_cast %c1_i32 : i32 to index
    %c0_28 = arith.constant 0 : index
    %c0_29 = arith.constant 0 : index
    %76 = vector.load %arg5[%75, %c0_28, %c0_29] : memref<4x8x128xf32, #tpu.memory_space<vmem>>, vector<1x8x128xf32>
    %77 = vector.shape_cast %76 : vector<1x8x128xf32> to vector<8x128xf32>
    %78 = vector.shape_cast %74 : vector<8x128xf32> to vector<1x8x128xf32>
    tpu.vector_store %arg5[%75, %c0_28, %c0_29], %78 {strides = array<i32>} : memref<4x8x128xf32, #tpu.memory_space<vmem>>, vector<1x8x128xf32>,
    %79 = arith.truncf %74 : vector<8x128xf32> to vector<8x128xbf16>
    %c2_i32 = arith.constant 2 : i32
    %c8_i32_30 = arith.constant 8 : i32
    %80 = arith.muli %c2_i32, %c8_i32_30 : i32
    %81 = tpu.assume_multiple %80, 8 : i32
    %82 = arith.index_cast %81 : i32 to index
    %c0_31 = arith.constant 0 : index
    %83 = vector.load %arg7[%82, %c0_31] : memref<32x512xf32, #tpu.memory_space<vmem>>, vector<8x512xf32>
    %cst_32 = arith.constant dense<0.000000e+00> : vector<8x512xf32>
    %84 = tpu.matmul %79, %10, %cst_32 {dimension_numbers = #tpu.dot_dimension_numbers<[1], [0], [0], [1], [0, 0, 1, 1], [], []>} : vector<8x128xbf16>, vector<128x512xbf16>, vector<8x512xf32> -> vector<8x512xf32>
    %85 = arith.addf %83, %84 : vector<8x512xf32>
    %cst_33 = arith.constant 5.000000e-01 : f32
    %86 = vector.broadcast %cst_33 : f32 to vector<8x512xf32>
    %87 = arith.mulf %86, %85 : vector<8x512xf32>
    %88 = arith.select %16, %85, %87 : vector<8x512xi1>, vector<8x512xf32>
    %89 = math.tanh %88 : vector<8x512xf32>
    %cst_34 = arith.constant 5.000000e-01 : f32
    %90 = vector.broadcast %cst_34 : f32 to vector<8x512xf32>
    %91 = arith.mulf %90, %89 : vector<8x512xf32>
    %cst_35 = arith.constant 5.000000e-01 : f32
    %92 = vector.broadcast %cst_35 : f32 to vector<8x512xf32>
    %93 = arith.addf %91, %92 : vector<8x512xf32>
    %94 = arith.select %16, %89, %93 : vector<8x512xi1>, vector<8x512xf32>
    %95 = vector.extract_strided_slice %94 {offsets = [0, 0], sizes = [8, 128], strides = [1, 1]} : vector<8x512xf32> to vector<8x128xf32>
    %96 = vector.extract_strided_slice %94 {offsets = [0, 128], sizes = [8, 128], strides = [1, 1]} : vector<8x512xf32> to vector<8x128xf32>
    %97 = vector.extract_strided_slice %94 {offsets = [0, 256], sizes = [8, 128], strides = [1, 1]} : vector<8x512xf32> to vector<8x128xf32>
    %98 = vector.extract_strided_slice %94 {offsets = [0, 384], sizes = [8, 128], strides = [1, 1]} : vector<8x512xf32> to vector<8x128xf32>
    %99 = arith.mulf %96, %72 : vector<8x128xf32>
    %100 = arith.mulf %95, %97 : vector<8x128xf32>
    %101 = arith.addf %99, %100 : vector<8x128xf32>
    %102 = math.tanh %101 : vector<8x128xf32>
    %103 = arith.mulf %98, %102 : vector<8x128xf32>
    %104 = arith.index_cast %c2_i32 : i32 to index
    %c0_36 = arith.constant 0 : index
    %c0_37 = arith.constant 0 : index
    %105 = vector.load %arg5[%104, %c0_36, %c0_37] : memref<4x8x128xf32, #tpu.memory_space<vmem>>, vector<1x8x128xf32>
    %106 = vector.shape_cast %105 : vector<1x8x128xf32> to vector<8x128xf32>
    %107 = vector.shape_cast %103 : vector<8x128xf32> to vector<1x8x128xf32>
    tpu.vector_store %arg5[%104, %c0_36, %c0_37], %107 {strides = array<i32>} : memref<4x8x128xf32, #tpu.memory_space<vmem>>, vector<1x8x128xf32>,
    %108 = arith.truncf %103 : vector<8x128xf32> to vector<8x128xbf16>
    %c3_i32 = arith.constant 3 : i32
    %c8_i32_38 = arith.constant 8 : i32
    %109 = arith.muli %c3_i32, %c8_i32_38 : i32
    %110 = tpu.assume_multiple %109, 8 : i32
    %111 = arith.index_cast %110 : i32 to index
    %c0_39 = arith.constant 0 : index
    %112 = vector.load %arg7[%111, %c0_39] : memref<32x512xf32, #tpu.memory_space<vmem>>, vector<8x512xf32>
    %cst_40 = arith.constant dense<0.000000e+00> : vector<8x512xf32>
    %113 = tpu.matmul %108, %10, %cst_40 {dimension_numbers = #tpu.dot_dimension_numbers<[1], [0], [0], [1], [0, 0, 1, 1], [], []>} : vector<8x128xbf16>, vector<128x512xbf16>, vector<8x512xf32> -> vector<8x512xf32>
    %114 = arith.addf %112, %113 : vector<8x512xf32>
    %cst_41 = arith.constant 5.000000e-01 : f32
    %115 = vector.broadcast %cst_41 : f32 to vector<8x512xf32>
    %116 = arith.mulf %115, %114 : vector<8x512xf32>
    %117 = arith.select %16, %114, %116 : vector<8x512xi1>, vector<8x512xf32>
    %118 = math.tanh %117 : vector<8x512xf32>
    %cst_42 = arith.constant 5.000000e-01 : f32
    %119 = vector.broadcast %cst_42 : f32 to vector<8x512xf32>
    %120 = arith.mulf %119, %118 : vector<8x512xf32>
    %cst_43 = arith.constant 5.000000e-01 : f32
    %121 = vector.broadcast %cst_43 : f32 to vector<8x512xf32>
    %122 = arith.addf %120, %121 : vector<8x512xf32>
    %123 = arith.select %16, %118, %122 : vector<8x512xi1>, vector<8x512xf32>
    %124 = vector.extract_strided_slice %123 {offsets = [0, 0], sizes = [8, 128], strides = [1, 1]} : vector<8x512xf32> to vector<8x128xf32>
    %125 = vector.extract_strided_slice %123 {offsets = [0, 128], sizes = [8, 128], strides = [1, 1]} : vector<8x512xf32> to vector<8x128xf32>
    %126 = vector.extract_strided_slice %123 {offsets = [0, 256], sizes = [8, 128], strides = [1, 1]} : vector<8x512xf32> to vector<8x128xf32>
    %127 = vector.extract_strided_slice %123 {offsets = [0, 384], sizes = [8, 128], strides = [1, 1]} : vector<8x512xf32> to vector<8x128xf32>
    %128 = arith.mulf %125, %101 : vector<8x128xf32>
    %129 = arith.mulf %124, %126 : vector<8x128xf32>
    %130 = arith.addf %128, %129 : vector<8x128xf32>
    %131 = math.tanh %130 : vector<8x128xf32>
    %132 = arith.mulf %127, %131 : vector<8x128xf32>
    %133 = arith.index_cast %c3_i32 : i32 to index
    %c0_44 = arith.constant 0 : index
    %c0_45 = arith.constant 0 : index
    %134 = vector.load %arg5[%133, %c0_44, %c0_45] : memref<4x8x128xf32, #tpu.memory_space<vmem>>, vector<1x8x128xf32>
    %135 = vector.shape_cast %134 : vector<1x8x128xf32> to vector<8x128xf32>
    %136 = vector.shape_cast %132 : vector<8x128xf32> to vector<1x8x128xf32>
    tpu.vector_store %arg5[%133, %c0_44, %c0_45], %136 {strides = array<i32>} : memref<4x8x128xf32, #tpu.memory_space<vmem>>, vector<1x8x128xf32>,
    %137 = arith.truncf %132 : vector<8x128xf32> to vector<8x128xbf16>
    %c4_i32 = arith.constant 4 : i32
    %c3 = arith.constant 3 : index
    %c0_46 = arith.constant 0 : index
    %c0_47 = arith.constant 0 : index
    %138 = vector.load %arg5[%c3, %c0_46, %c0_47] : memref<4x8x128xf32, #tpu.memory_space<vmem>>, vector<1x8x128xf32>
    %139 = vector.shape_cast %138 : vector<1x8x128xf32> to vector<8x128xf32>
    %c0_48 = arith.constant 0 : index
    %c0_49 = arith.constant 0 : index
    %c0_50 = arith.constant 0 : index
    %140 = vector.load %arg6[%c0_48, %c0_49, %c0_50] : memref<2x8x128xf32, #tpu.memory_space<vmem>>, vector<1x8x128xf32>
    %141 = vector.shape_cast %140 : vector<1x8x128xf32> to vector<8x128xf32>
    %142 = vector.shape_cast %139 : vector<8x128xf32> to vector<1x8x128xf32>
    tpu.vector_store %arg6[%c0_48, %c0_49, %c0_50], %142 {strides = array<i32>} : memref<2x8x128xf32, #tpu.memory_space<vmem>>, vector<1x8x128xf32>,
    %c1_51 = arith.constant 1 : index
    %c0_52 = arith.constant 0 : index
    %c0_53 = arith.constant 0 : index
    %143 = vector.load %arg6[%c1_51, %c0_52, %c0_53] : memref<2x8x128xf32, #tpu.memory_space<vmem>>, vector<1x8x128xf32>
    %144 = vector.shape_cast %143 : vector<1x8x128xf32> to vector<8x128xf32>
    %145 = vector.shape_cast %130 : vector<8x128xf32> to vector<1x8x128xf32>
    tpu.vector_store %arg6[%c1_51, %c0_52, %c0_53], %145 {strides = array<i32>} : memref<2x8x128xf32, #tpu.memory_space<vmem>>, vector<1x8x128xf32>,
    return
  }
  func.func @transform_0(%arg0: i32) -> (i32, i32) {
    %c0_i32 = arith.constant 0 : i32
    %c0_i32_0 = arith.constant 0 : i32
    return %arg0, %c0_i32 : i32, i32
  }
  func.func @transform_1(%arg0: i32) -> (i32, i32, i32) {
    %c0_i32 = arith.constant 0 : i32
    %c0_i32_0 = arith.constant 0 : i32
    %c0_i32_1 = arith.constant 0 : i32
    %c0_i32_2 = arith.constant 0 : i32
    return %c0_i32, %c0_i32_0, %c0_i32_1 : i32, i32, i32
  }
  func.func @transform_2(%arg0: i32) -> (i32, i32) {
    %c0_i32 = arith.constant 0 : i32
    %c0_i32_0 = arith.constant 0 : i32
    %c0_i32_1 = arith.constant 0 : i32
    return %c0_i32, %c0_i32_0 : i32, i32
  }
  func.func @transform_3(%arg0: i32) -> (i32, i32) {
    %c0_i32 = arith.constant 0 : i32
    %c0_i32_0 = arith.constant 0 : i32
    %c0_i32_1 = arith.constant 0 : i32
    return %c0_i32, %c0_i32_0 : i32, i32
  }
  func.func @transform_4(%arg0: i32) -> (i32, i32, i32) {
    %c0_i32 = arith.constant 0 : i32
    %c0_i32_0 = arith.constant 0 : i32
    %c0_i32_1 = arith.constant 0 : i32
    return %arg0, %c0_i32, %c0_i32_0 : i32, i32, i32
  }
  func.func @transform_5(%arg0: i32) -> (i32, i32, i32) {
    %c0_i32 = arith.constant 0 : i32
    %c0_i32_0 = arith.constant 0 : i32
    %c0_i32_1 = arith.constant 0 : i32
    %c0_i32_2 = arith.constant 0 : i32
    return %c0_i32, %c0_i32_0, %c0_i32_1 : i32, i32, i32
  }
}

</mosaic_0001>

<bundles_post_ra>
// kernel: encoder_rnn_forward.1
= control target key start
LH: loop header
LB: loop body
LE: loop exit
PB: predicated region body
PF: predicated region fallthrough
CT: control target
= control target key end

     0   :  { %11 = vsyncpa [#allocation4], 0  ;;  %s2446_s0 = inlined_call_operand.hbm [shape: bf16[64,32], index: 0, kind: input, shape index: {}]   ;;  %s2447_s1 = inlined_call_operand.hbm [shape: f32[2,8,128], index: 1, kind: input, shape index: {}, may-alias: {1,5}]   ;;  %s2448_s2 = inlined_call_operand.hbm [shape: bf16[160,512], index: 2, kind: input, shape index: {}]   ;;  %s2449_s3 = inlined_call_operand.hbm [shape: f32[1,512], index: 3, kind: input, shape index: {}]   ;;  %s2450_s4 = inlined_call_operand.hbm [shape: f32[8,8,128], index: 4, kind: output, shape index: {0}]   ;;  %s2451_s5 = inlined_call_operand.hbm [shape: f32[2,8,128], index: 5, kind: output, shape index: {1}, may-alias: {1,5}]  }
   0x1   :  { %13 = vsyncpa [#allocation4 + $0x1], 0 }
   0x2   :  { %14 = vsyncpa [#allocation7], 0 }
   0x3   :  { %15 = vsyncpa [#allocation10], 0 }
   0x4   :  { %16 = vsyncpa [#allocation5], 0 }
   0x5   :  { %18 = vsyncpa [#allocation5 + $0x1], 0 }
   0x6   :  { %19 = vsyncpa [#allocation13], 0  ;;  %s1900_s18 = smov 0   ;;  %s1902_s19 = smov 0  }
   0x7   :  { %s1904_s20 = smov 0   ;;  %s1906_s21 = smov 0  }
   0x8 LB: > { %s1921_s22 = sadd.s32 4294967295, %s1853_s21   ;;  %s1365_s23 = sadd.s32 4294967294, %s1853_s21   ;;  %s1853_s21 = sphi %s1906_s21, %s2496_s21   ;;  %s1849_s20 = sphi %s1904_s20, %s2495_s20   ;;  %s1845_s19 = sphi %s1902_s19, %s2494_s19   ;;  %s1841_s18 = sphi %s1900_s18, %s2493_s18  }
   0x9   : > { %p45_p0 = scmp.ne.s32.totalorder %s1845_s19, %s1841_s18  ;;  %p2452_p1 = scmp.eq.s32.totalorder %s1921_s22, 0 }
   0xa   : > { %p138_p3 = scmp.eq.s32.totalorder %s1365_s23, 1  ;;  %p1366_p5 = scmp.ge.s32.totalorder %s1853_s21, 1 }
   0xb   : > { %p1930_p4 = por %p2452_p1, %p45_p0  ;;  %p166_p7 = scmp.lt.s32.totalorder %s1853_s21, 3 }
   0xc   : > { %p1935_p6 = por %p138_p3, %p45_p0  ;;  %s1855_s27 = smov [#allocation6]  }
   0xd   : > { %s2457_s24 = scalar_select %p1930_p4, 1, 0 }
   0xe   : > { %s2458_s25 = scalar_select %p1935_p6, 1, 0 }
   0xf   : > { %p1941_p9 = pnand %p1366_p5, %p166_p7  ;;  %s178_s28 = sshll.u32 %s1855_s27, 4  ;;  %s1945_s28 = int_to_ptr.vmem [resolvable:$true] %s178_s28 }
  0x10   : > { %s1856_s30 = smov [#allocation8]   ;;  %s1635_s9 = scalar_lea.hbm %s2447_s1, 256 }
  0x11   : > { %s2459_s26 = scalar_select %p1941_p9, 1, 0 }
  0x12   : > { %p1460_p10 = pneg %p1941_p9  ;;  %s191_s6 = sshll.u32 %s1856_s30, 4  ;;  %s1956_s6 = int_to_ptr.vmem [resolvable:$true] %s191_s6 }
  0x13   : > { %p1636_p13 = scmp.ne.s32.totalorder %s2447_s1, %s1635_s9  ;;  %p1642_p7 = scmp.lt.u32.totalorder %s1635_s9, %s2447_s1 }
  0x14   : > { %p1952_p12 = pnand %p1460_p10, %p2452_p1 }
  0x16   : > { %p1966_p0 = pneg %p1952_p12 }
  0x18   : > { %p1638_p3 = pnand %p1966_p0, %p1636_p13 }
  0x1a   : > { %p1639_p5 = pneg %p1638_p3 }
  0x1c   : > { %p1644_p10 = pnand %p1642_p7, %p1639_p5 }
  0x1e   : > { %1647 = shalt.err (!%p1644_p10)
}
  0x1f   : > { %s1648_s15 = scalar_lea.vmem %s1945_s28, 256  ;;  %p1656_p2 = scmp.lt.s32.totalorder %s1945_s28, %s1945_s28 }
  0x20   : > { %p1649_p11 = scmp.ne.s32.totalorder %s1945_s28, %s1648_s15  ;;  %p1657_p6 = scmp.lt.s32.totalorder %s1648_s15, %s1648_s15 }
  0x22   : > { %p1651_p8 = pnand %p1649_p11, %p1966_p0  ;;  %p1658_p13 = por %p1657_p6, %p1656_p2 }
  0x24   : > { %p1652_p1 = pneg %p1651_p8 }
  0x26   : > { %p1659_p3 = pnand %p1658_p13, %p1652_p1 }
  0x28   : > { %1662 = shalt.err (!%p1659_p3)
}
  0x29   : > { %s1857_s16 = smov 128   ;;  %s1858_s17 = smov 8  }
  0x2a   : > { %1463 = dma.hbm_to_vmem [thread:$0]  (!%p1952_p12), %s2447_s1, 256, %s1945_s28, [#allocation7], %s1857_s16, %s1857_s16, %s1858_s17  }
  0x2b   : > { %s1663_s8 = scalar_lea.hbm %s2448_s2, 5120 }
  0x2c   : > { %p1664_p2 = scmp.ne.s32.totalorder %s2448_s2, %s1663_s8  ;;  %p1670_p8 = scmp.lt.u32.totalorder %s1663_s8, %s2448_s2 }
  0x2e   : > { %p1666_p1 = pnand %p1664_p2, %p1966_p0 }
  0x30   : > { %p1667_p6 = pneg %p1666_p1 }
  0x32   : > { %p1672_p11 = pnand %p1670_p8, %p1667_p6 }
  0x34   : > { %1675 = shalt.err (!%p1672_p11)
}
  0x35   : > { %s1676_s28 = scalar_lea.vmem %s1956_s6, 5120  ;;  %p1684_p13 = scmp.lt.s32.totalorder %s1956_s6, %s1956_s6 }
  0x36   : > { %p1677_p5 = scmp.ne.s32.totalorder %s1956_s6, %s1676_s28  ;;  %p1685_p3 = scmp.lt.s32.totalorder %s1676_s28, %s1676_s28 }
  0x38   : > { %p1679_p7 = pnand %p1677_p5, %p1966_p0  ;;  %p1686_p2 = por %p1685_p3, %p1684_p13 }
  0x3a   : > { %p1680_p10 = pneg %p1679_p7 }
  0x3c   : > { %p1687_p1 = pnand %p1686_p2, %p1680_p10 }
  0x3e   : > { %1690 = shalt.err (!%p1687_p1)
}
  0x3f   : > { %s1859_s14 = smov 256   ;;  %s1860_s15 = smov 16  }
  0x40   : > { %1466 = dma.hbm_to_vmem [thread:$0]  (!%p1952_p12), %s2448_s2, 5120, %s1956_s6, [#allocation7], %s1859_s14, %s1859_s14, %s1860_s15  }
  0x41   : > { %s1861_s23 = smov [#allocation9]   ;;  %s2011_s30 = sadd.s32 1, %s1853_s21  }
  0x42   : > { %s205_s27 = sshll.u32 %s1861_s23, 4  ;;  %s1691_s9 = scalar_lea.hbm %s2449_s3, 64  ;;  %s206_s27 = int_to_ptr.vmem [resolvable:$true] %s205_s27 }
  0x43   : > { %p1692_p6 = scmp.ne.s32.totalorder %s2449_s3, %s1691_s9  ;;  %p1698_p5 = scmp.lt.u32.totalorder %s1691_s9, %s2449_s3 }
  0x45   : > { %p1694_p8 = pnand %p1692_p6, %p1966_p0 }
  0x47   : > { %p1695_p11 = pneg %p1694_p8 }
  0x49   : > { %p1700_p7 = pnand %p1698_p5, %p1695_p11 }
  0x4b   : > { %1703 = shalt.err (!%p1700_p7)
}
  0x4c   : > { %s1704_s6 = scalar_lea.vmem %s206_s27, 64  ;;  %p1712_p2 = scmp.lt.s32.totalorder %s206_s27, %s206_s27 }
  0x4d   : > { %p1705_p10 = scmp.ne.s32.totalorder %s206_s27, %s1704_s6  ;;  %p1713_p1 = scmp.lt.s32.totalorder %s1704_s6, %s1704_s6 }
  0x4f   : > { %p1707_p13 = pnand %p1705_p10, %p1966_p0  ;;  %p1714_p4 = por %p1713_p1, %p1712_p2 }
  0x51   : > { %p1708_p3 = pneg %p1707_p13 }
  0x53   : > { %p1715_p9 = pnand %p1714_p4, %p1708_p3 }
  0x55   : > { %1718 = shalt.err (!%p1715_p9)
}
  0x56   : > { %1469 = dma.hbm_to_vmem [thread:$0]  (!%p1952_p12), %s2449_s3, 64, %s206_s27, [#allocation10]  }
  0x57   : > { %s29_s12 = ssub.s32 %s1853_s21, %s2011_s30  ;;  %s32_s16 = sadd.s32 1, %s1849_s20 }
  0x58   : > { %p30_p4 = scmp.eq.s32.totalorder %s29_s12, 0  ;;  %p39_p9 = scmp.ne.s32.totalorder %s1849_s20, %s1845_s19 }
  0x59   : > { %p40_p0 = scmp.eq.s32.totalorder %s1853_s21, 0  ;;  %p1481_p6 = scmp.lt.s32.totalorder %s1853_s21, 2 }
  0x5a   : > { %s2039_s29 = scalar_select %p30_p4, %s1849_s20, %s32_s16  }
  0x5b   : > { %p41_p8 = por %p40_p0, %p39_p9  ;;  %p2462_p11 = scmp.eq.s32.totalorder %s1921_s22, 1 }
  0x5c   : > { %s216_s23 = sand.u32 1, %s1849_s20   ;;  %s1438_s7 = sshll.u32 %s1853_s21, 8 }
  0x5d   : > { %p2043_p5 = por %p2462_p11, %p39_p9  ;;  %s1371_s8 = sshll.u32 %s216_s23, 4 }
  0x5e   : > { %s2052_s27 = scalar_lea.hbm %s2446_s0, %s1438_s7  ;;  %s220_s11 = scalar_lea.vmem [#allocation3], %s1371_s8 }
  0x5f   : > { %s227_s13 = sshll.u32 %s220_s11, 4  ;;  %p2054_p12 = pnand %p1481_p6, %p41_p8  ;;  %s2058_s13 = int_to_ptr.vmem [resolvable:$true] %s227_s13 }
  0x60   : > { %s2060_s6 = scalar_lea.sflag [#allocation4], %s216_s23  ;;  %s1719_s14 = scalar_lea.hbm %s2052_s27, 256 }
  0x61   : > { %p1720_p7 = scmp.ne.s32.totalorder %s2052_s27, %s1719_s14  ;;  %p1721_p10 = pneg %p2054_p12 }
  0x62   : > { %s1724_s16 = scalar_lea.hbm %s2446_s0, 512  ;;  %p1725_p2 = scmp.lt.u32.totalorder %s2052_s27, %s2446_s0 }
  0x63   : > { %p1722_p13 = pnand %p1721_p10, %p1720_p7  ;;  %p1726_p1 = scmp.lt.u32.totalorder %s1724_s16, %s1719_s14 }
  0x64   : > { %p1728_p9 = scmp.lt.u32.totalorder %s1719_s14, %s2052_s27 }
  0x65   : > { %p1723_p3 = pneg %p1722_p13  ;;  %p1727_p4 = por %p1726_p1, %p1725_p2 }
  0x67   : > { %p1729_p0 = por %p1728_p9, %p1727_p4 }
  0x69   : > { %p1730_p6 = pnand %p1729_p0, %p1723_p3 }
  0x6b   : > { %1733 = shalt.err (!%p1730_p6)
}
  0x6c   : > { %s1734_s23 = scalar_lea.vmem %s2058_s13, 256  ;;  %s1862_s9 = smov [#allocation3]  }
  0x6d   : > { %p1735_p8 = scmp.ne.s32.totalorder %s2058_s13, %s1734_s23  ;;  %s1739_s10 = sshll.u32 %s1862_s9, 4  ;;  %s1740_s10 = int_to_ptr.vmem [resolvable:$false] %s1739_s10 }
  0x6e   : > { %s1741_s11 = scalar_lea.vmem %s1740_s10, 512  ;;  %p1742_p13 = scmp.lt.s32.totalorder %s2058_s13, %s1740_s10 }
  0x6f   : > { %p1737_p11 = pnand %p1735_p8, %p1721_p10  ;;  %p1743_p2 = scmp.lt.s32.totalorder %s1741_s11, %s1734_s23 }
  0x71   : > { %p1738_p7 = pneg %p1737_p11  ;;  %p1744_p1 = por %p1743_p2, %p1742_p13 }
  0x73   : > { %p1745_p4 = pnand %p1744_p1, %p1738_p7 }
  0x75   : > { %1748 = shalt.err (!%p1745_p4)
}
  0x76   : > { %s1863_s14 = smov 64   ;;  %s1864_s15 = smov 4  }
  0x77   : > { %1473 = dma.hbm_to_vmem [thread:$0]  (!%p2054_p12), %s2052_s27, 256, %s2058_s13, %s2060_s6, %s1863_s14, %s1863_s14, %s1864_s15  }
  0x78   : > { %p2465_p10 = scmp.ne.s32.totalorder %s2459_s26, 0 }
  0x7a   : > { %239 = sbr.rel (%p2465_p10) target bundleno = 1236 (0x4d4), region = 36 }
  0x81   : > { %s2091_s12 = sand.u32 1, %s1845_s19   ;;  %p2466_p3 = scmp.ne.s32.totalorder %s2457_s24, 0 }
  0x82   : > { %s1375_s16 = sshll.u32 %s2091_s12, 4  ;;  %s242_s7 = scalar_lea.sflag [#allocation4], %s2091_s12 }
  0x83   : > { %s2095_s8 = scalar_lea.vmem [#allocation3], %s1375_s16 }
  0x84   : > { %1820 = dma.done.wait (%p2466_p3), %s242_s7, 256  }
  0x85   : > { %1822 = vsyncadd (%p2466_p3), %s242_s7, 4294967040  ;;  %p2467_p12 = scmp.eq.s32.totalorder %s1921_s22, 0 }
  0x87   : > { %1824 = dma.done.wait (%p2467_p12), [#allocation7], 5376   ;;  %p2468_p9 = pmov %p2467_p12 }
  0x89   : > { %1826 = vsyncadd (%p2468_p9), [#allocation7], 4294961920  ;;  %p2469_p0 = pmov %p2468_p9 }
  0x8b   : > { %1828 = dma.done.wait (%p2469_p0), [#allocation10], 64   ;;  %p2470_p6 = pmov %p2469_p0 }
  0x8c   : > { %s1379_s26 = sshll.u32 %s2091_s12, 5  ;;  %p2471_p8 = scmp.ne.s32.totalorder %s1921_s22, 0 }
  0x8d   : > { %1830 = vsyncadd (%p2470_p6), [#allocation10], 4294967232  ;;  %s2110_s27 = scalar_lea.vmem [#allocation11], %s1379_s26  ;;  %v291_v0 = vld [vmem:[#allocation6] sm:$0xff] (!%p2471_p8)  ;;  %v292_v1 = vld [vmem:[#allocation6 + $0x8] sm:$0xff] (!%p2471_p8) }
  0x8e   : > { %290 = sbr.rel (%p2471_p8) target bundleno = 149 (0x95), region = 56  ;;  %293 = vst [vmem:[#allocation12] sm:$0xff] (!%p2471_p8), %v291_v0  ;;  %294 = vst [vmem:[#allocation12 + $0x8] sm:$0xff] (!%p2471_p8), %v292_v1 }
  0x95 PF: > { %v1533_v2 = vld [vmem:[#allocation8 + $0x4] ss:$16 sps:$4 sm:$0xff]   ;;  %v1535_v3 = vld [vmem:[#allocation8 + $0xc] ss:$16 sps:$4 sm:$0xff]   ;;  %v2455_v4 = vmov 0   ;;  %vm379_vm0 = vcmask 261120   ;;  %v309_v47 = vlaneseq }
  0x96   : > { %418 = vmatprep.mubr.bf16.mxu0 %v2455_v4  ;;  %471 = vmatprep.mubr.bf16.mxu1 %v2455_v4  ;;  %v1537_v5 = vld [vmem:[#allocation8] ss:$16 sps:$4 sm:$0xff]   ;;  %v1538_v6 = vld [vmem:[#allocation8 + $0x8] ss:$16 sps:$4 sm:$0xff]   ;;  %v1539_v7 = vld [vmem:[#allocation8 + $0x24] ss:$16 sps:$4 sm:$0xff]  }
  0x97   : > { %386 = vmatprep.subr.bf16.mxu0 %v1533_v2  ;;  %439 = vmatprep.subr.bf16.mxu1 %v1535_v3  ;;  %v1541_v8 = vld [vmem:[#allocation8 + $0x2c] ss:$16 sps:$4 sm:$0xff]   ;;  %v1543_v9 = vld [vmem:[#allocation8 + $0x20] ss:$16 sps:$4 sm:$0xff]   ;;  %v1544_v10 = vld [vmem:[#allocation8 + $0x28] ss:$16 sps:$4 sm:$0xff]  }
  0x98   : > { %387 = vmatpush1.bf16.msra.mxu0 %v1537_v5  ;;  %440 = vmatpush1.bf16.msra.mxu1 %v1538_v6  ;;  %v1545_v11 = vld [vmem:[%s2095_s8] sm:$0xff]   ;;  %v2119_v13 = vld [vmem:[#allocation8 + $0x4c] ss:$16 sps:$4 sm:$0xff]   ;;  %v2123_v15 = vld [vmem:[#allocation8 + $0x48] ss:$16 sps:$4 sm:$0xff]   ;;  %v310_v48 = vshrl.u32 %v309_v47, 7 }
  0x99   : > { %388 = vmatprep.subr.bf16.mxu0 %v1539_v7  ;;  %441 = vmatprep.subr.bf16.mxu1 %v1541_v8  ;;  %v2117_v12 = vld [vmem:[#allocation8 + $0x44] ss:$16 sps:$4 sm:$0xff]   ;;  %v2121_v14 = vld [vmem:[#allocation8 + $0x40] ss:$16 sps:$4 sm:$0xff]   ;;  %v2129_v17 = vld [vmem:[#allocation8 + $0x6c] ss:$16 sps:$4 sm:$0xff]  }
  0x9a   : > { %v2126_v16 = vld [vmem:[#allocation8 + $0x64] ss:$16 sps:$4 sm:$0xff]   ;;  %v2133_v18 = vld [vmem:[#allocation8 + $0x60] ss:$16 sps:$4 sm:$0xff]   ;;  %v2137_v19 = vld [vmem:[#allocation8 + $0x68] ss:$16 sps:$4 sm:$0xff]  }
  0x9b   : > { %v2141_v20 = vld [vmem:[#allocation8 + $0x84] ss:$16 sps:$4 sm:$0xff]   ;;  %v2143_v21 = vld [vmem:[#allocation8 + $0x8c] ss:$16 sps:$4 sm:$0xff]   ;;  %v2149_v22 = vld [vmem:[#allocation8 + $0x80] ss:$16 sps:$4 sm:$0xff]  }
  0x9c   : > { %389 = vmatpush1.bf16.msra.mxu0 %v1543_v9  ;;  %442 = vmatpush1.bf16.msra.mxu1 %v1544_v10  ;;  %v2151_v23 = vld [vmem:[#allocation8 + $0x88] ss:$16 sps:$4 sm:$0xff]   ;;  %v2153_v24 = vld [vmem:[#allocation8 + $0xa4] ss:$16 sps:$4 sm:$0xff]   ;;  %v2157_v25 = vld [vmem:[#allocation8 + $0xac] ss:$16 sps:$4 sm:$0xff]  }
  0x9d   : > { %728 = vmatprep.subr.bf16.mxu0 %v2117_v12  ;;  %769 = vmatprep.subr.bf16.mxu1 %v2119_v13  ;;  %v2159_v26 = vld [vmem:[#allocation8 + $0xa0] ss:$16 sps:$4 sm:$0xff]   ;;  %v2161_v27 = vld [vmem:[#allocation8 + $0xa8] ss:$16 sps:$4 sm:$0xff]   ;;  %v2165_v28 = vld [vmem:[#allocation8 + $0xc4] ss:$16 sps:$4 sm:$0xff]  }
  0x9e   : > { %v2169_v29 = vld [vmem:[#allocation8 + $0xcc] ss:$16 sps:$4 sm:$0xff]   ;;  %v2172_v31 = vld [vmem:[#allocation8 + $0xc0] ss:$16 sps:$4 sm:$0xff]   ;;  %v2176_v32 = vld [vmem:[#allocation8 + $0xc8] ss:$16 sps:$4 sm:$0xff]  }
  0x9f   : > { %1391 = vmatmul.mubr.msk.bf16.vlgmr.msra.gmra.mrb[0].mxu0 %vm379_vm0, %v1545_v11  ;;  %1393 = vmatmul.mubr.msk.bf16.vlgmr.msra.gmra.mrb[0].mxu1 %vm379_vm0, %v1545_v11  ;;  %v1580_v30 = vld [vmem:[%s2095_s8 + $0x8] sm:$0xff]   ;;  %v2180_v33 = vld [vmem:[#allocation8 + $0xe4] ss:$16 sps:$4 sm:$0xff]   ;;  %v2190_v35 = vld [vmem:[#allocation8 + $0xe0] ss:$16 sps:$4 sm:$0xff]   ;;  %v311_v49 = vsub.s32 0, %v310_v48 }
  0xa0   : > { %729 = vmatpush1.bf16.msra.mxu0 %v2121_v14  ;;  %770 = vmatpush1.bf16.msra.mxu1 %v2123_v15  ;;  %v2182_v34 = vld [vmem:[#allocation8 + $0xec] ss:$16 sps:$4 sm:$0xff]   ;;  %v2192_v36 = vld [vmem:[#allocation8 + $0xe8] ss:$16 sps:$4 sm:$0xff]   ;;  %v2196_v37 = vld [vmem:[#allocation8 + $0x104] ss:$16 sps:$4 sm:$0xff]  }
  0xa1   : > { %730 = vmatprep.subr.bf16.mxu0 %v2126_v16  ;;  %771 = vmatprep.subr.bf16.mxu1 %v2129_v17  ;;  %v2198_v38 = vld [vmem:[#allocation8 + $0x10c] ss:$16 sps:$4 sm:$0xff]   ;;  %v2202_v39 = vld [vmem:[#allocation8 + $0x100] ss:$16 sps:$4 sm:$0xff]   ;;  %v2204_v40 = vld [vmem:[#allocation8 + $0x108] ss:$16 sps:$4 sm:$0xff]  }
  0xa2   : > { %428 = vmatprep.mubr.bf16.mxu0 %v2455_v4  ;;  %481 = vmatprep.mubr.bf16.mxu1 %v2455_v4  ;;  %v2208_v41 = vld [vmem:[#allocation8 + $0x124] ss:$16 sps:$4 sm:$0xff]   ;;  %v2210_v42 = vld [vmem:[#allocation8 + $0x12c] ss:$16 sps:$4 sm:$0xff]   ;;  %v2214_v43 = vld [vmem:[#allocation8 + $0x120] ss:$16 sps:$4 sm:$0xff]  }
  0xa3   : > { %v2216_v44 = vld [vmem:[#allocation8 + $0x128] ss:$16 sps:$4 sm:$0xff]   ;;  %v319_v50 = vsub.s32 2, %v310_v48  ;;  %v307_v51 = vld [vmem:[#allocation9] sm:$0xf]  ;;  %v323_v52 = vsub.s32 3, %v310_v48 }
  0xa4   : > { %731 = vmatpush1.bf16.msra.mxu0 %v2133_v18  ;;  %772 = vmatpush1.bf16.msra.mxu1 %v2137_v19  ;;  %v557_v45 = vld [vmem:[#allocation12] sm:$0xff]  ;;  %v315_v53 = vsub.s32 1, %v310_v48  ;;  %v312_v54 = vrot.slane %v307_v51, %v311_v49  ;;  %s1439_s24 = sshll.u32 %s1921_s22, 9  ;;  %s1236_s13 = sshll.u32 %s2110_s27, 4  ;;  %s2378_s13 = int_to_ptr.vmem [resolvable:$true] %s1236_s13 }
  0xa5   : > { %732 = vmatprep.subr.bf16.mxu0 %v2141_v20  ;;  %773 = vmatprep.subr.bf16.mxu1 %v2143_v21  ;;  %v558_v46 = vpack.c.bf16 %v557_v45, %v557_v45  ;;  %v320_v55 = vrot.slane %v307_v51, %v319_v50  ;;  %v324_v58 = vrot.slane %v307_v51, %v323_v52  ;;  %s2376_s23 = scalar_lea.hbm %s2450_s4, %s1439_s24  ;;  %s1223_s9 = scalar_lea.sflag [#allocation5], %s2091_s12 }
  0xa6   : > { %v316_v61 = vrot.slane %v307_v51, %v315_v53  ;;  %s1749_s10 = scalar_lea.vmem %s2378_s13, 512  ;;  %s1866_s11 = smov [#allocation11]  }
  0xa7   : > { %1392 = vmatmul.mubr.msk.bf16.gmra.mrb[4].mxu0 %vm379_vm0, %v1580_v30  ;;  %1394 = vmatmul.mubr.msk.bf16.gmra.mrb[4].mxu1 %vm379_vm0, %v1580_v30  ;;  %p1750_p11 = scmp.ne.s32.totalorder %s2378_s13, %s1749_s10  ;;  %s1753_s14 = sshll.u32 %s1866_s11, 4  ;;  %s1754_s14 = int_to_ptr.vmem [resolvable:$false] %s1753_s14 }
  0xa8   : > { %733 = vmatpush1.bf16.msra.mxu0 %v2149_v22  ;;  %774 = vmatpush1.bf16.msra.mxu1 %v2151_v23  ;;  %s1755_s15 = scalar_lea.vmem %s1754_s14, 1024  ;;  %p1756_p2 = scmp.lt.s32.totalorder %s2378_s13, %s1754_s14 }
  0xa9   : > { %734 = vmatprep.subr.bf16.mxu0 %v2153_v24  ;;  %775 = vmatprep.subr.bf16.mxu1 %v2157_v25  ;;  %p1751_p7 = pnand %p1750_p11, %p2043_p5  ;;  %p1757_p1 = scmp.lt.s32.totalorder %s1755_s15, %s1749_s10 }
  0xaa   : > { %760 = vmatprep.mubr.bf16.mxu0 %v2455_v4  ;;  %801 = vmatprep.mubr.bf16.mxu1 %v2455_v4 }
  0xab   : > { %p1752_p13 = pneg %p1751_p7  ;;  %p1758_p4 = por %p1757_p1, %p1756_p2 }
  0xac   : > { %735 = vmatpush1.bf16.msra.mxu0 %v2159_v26  ;;  %776 = vmatpush1.bf16.msra.mxu1 %v2161_v27 }
  0xad   : > { %736 = vmatprep.subr.bf16.mxu0 %v2165_v28  ;;  %777 = vmatprep.subr.bf16.mxu1 %v2169_v29  ;;  %p1759_p10 = pnand %p1758_p4, %p1752_p13 }
  0xb0   : > { %737 = vmatpush1.bf16.msra.mxu0 %v2172_v31  ;;  %778 = vmatpush1.bf16.msra.mxu1 %v2176_v32 }
  0xb1   : > { %738 = vmatprep.subr.bf16.mxu0 %v2180_v33  ;;  %779 = vmatprep.subr.bf16.mxu1 %v2182_v34 }
  0xb4   : > { %739 = vmatpush1.bf16.msra.mxu0 %v2190_v35  ;;  %780 = vmatpush1.bf16.msra.mxu1 %v2192_v36 }
  0xb5   : > { %740 = vmatprep.subr.bf16.mxu0 %v2196_v37  ;;  %781 = vmatprep.subr.bf16.mxu1 %v2198_v38 }
  0xb8   : > { %741 = vmatpush1.bf16.msra.mxu0 %v2202_v39  ;;  %782 = vmatpush1.bf16.msra.mxu1 %v2204_v40 }
  0xb9   : > { %742 = vmatprep.subr.bf16.mxu0 %v2208_v41  ;;  %783 = vmatprep.subr.bf16.mxu1 %v2210_v42 }
  0xbc   : > { %743 = vmatpush1.bf16.msra.mxu0 %v2214_v43  ;;  %784 = vmatpush1.bf16.msra.mxu1 %v2216_v44 }
  0xbd   : > { %852 = vmatprep.subr.bf16.mxu0 %v2117_v12  ;;  %893 = vmatprep.subr.bf16.mxu1 %v2119_v13 }
  0xbf   : > { %761 = vmatmul.mubr.bf16.vlgmr.msra.gmra.mrb[8].mxu0 %v558_v46  ;;  %802 = vmatmul.mubr.bf16.vlgmr.msra.gmra.mrb[8].mxu1 %v558_v46 }
  0xc0   : > { %853 = vmatpush1.bf16.msra.mxu0 %v2121_v14  ;;  %894 = vmatpush1.bf16.msra.mxu1 %v2123_v15 }
  0xc1   : > { %854 = vmatprep.subr.bf16.mxu0 %v2126_v16  ;;  %895 = vmatprep.subr.bf16.mxu1 %v2129_v17 }
  0xc2   : > { %884 = vmatprep.mubr.bf16.mxu0 %v2455_v4  ;;  %925 = vmatprep.mubr.bf16.mxu1 %v2455_v4 }
  0xc4   : > { %855 = vmatpush1.bf16.msra.mxu0 %v2133_v18  ;;  %896 = vmatpush1.bf16.msra.mxu1 %v2137_v19 }
  0xc5   : > { %856 = vmatprep.subr.bf16.mxu0 %v2141_v20  ;;  %897 = vmatprep.subr.bf16.mxu1 %v2143_v21 }
  0xc8   : > { %857 = vmatpush1.bf16.msra.mxu0 %v2149_v22  ;;  %898 = vmatpush1.bf16.msra.mxu1 %v2151_v23 }
  0xc9   : > { %858 = vmatprep.subr.bf16.mxu0 %v2153_v24  ;;  %899 = vmatprep.subr.bf16.mxu1 %v2157_v25 }
  0xcc   : > { %859 = vmatpush1.bf16.msra.mxu0 %v2159_v26  ;;  %900 = vmatpush1.bf16.msra.mxu1 %v2161_v27 }
  0xcd   : > { %860 = vmatprep.subr.bf16.mxu0 %v2165_v28  ;;  %901 = vmatprep.subr.bf16.mxu1 %v2169_v29 }
  0xd0   : > { %861 = vmatpush1.bf16.msra.mxu0 %v2172_v31  ;;  %902 = vmatpush1.bf16.msra.mxu1 %v2176_v32 }
  0xd1   : > { %862 = vmatprep.subr.bf16.mxu0 %v2180_v33  ;;  %903 = vmatprep.subr.bf16.mxu1 %v2182_v34 }
  0xd4   : > { %863 = vmatpush1.bf16.msra.mxu0 %v2190_v35  ;;  %904 = vmatpush1.bf16.msra.mxu1 %v2192_v36 }
  0xd5   : > { %864 = vmatprep.subr.bf16.mxu0 %v2196_v37  ;;  %905 = vmatprep.subr.bf16.mxu1 %v2198_v38 }
  0xd8   : > { %865 = vmatpush1.bf16.msra.mxu0 %v2202_v39  ;;  %906 = vmatpush1.bf16.msra.mxu1 %v2204_v40 }
  0xd9   : > { %866 = vmatprep.subr.bf16.mxu0 %v2208_v41  ;;  %907 = vmatprep.subr.bf16.mxu1 %v2210_v42 }
  0xdc   : > { %867 = vmatpush1.bf16.msra.mxu0 %v2214_v43  ;;  %908 = vmatpush1.bf16.msra.mxu1 %v2216_v44 }
  0xdd   : > { %977 = vmatprep.subr.bf16.mxu0 %v2117_v12  ;;  %1018 = vmatprep.subr.bf16.mxu1 %v2119_v13 }
 0x172   : > { %v420_v56 = vpop.f32.mrb[0].mxu0  ;;  %v473_v57 = vpop.f32.mrb[0].mxu1 }
 0x173   : > { %v422_v59 = vpop.f32.mrb[1].mxu0  ;;  %v475_v60 = vpop.f32.mrb[1].mxu1 }
 0x174   : > { %v424_v62 = vpop.f32.mrb[2].mxu0  ;;  %v477_v63 = vpop.f32.mrb[2].mxu1 }
 0x175   : > { %v2258_v0 = vadd.f32 %v424_v62, %v312_v54  ;;  %v426_v1 = vpop.f32.mrb[3].mxu0  ;;  %v2260_v2 = vadd.f32 %v477_v63, %v320_v55  ;;  %v479_v3 = vpop.f32.mrb[3].mxu1  ;;  %v421_v63 = vadd.f32 %v420_v56, %v312_v54 }
 0x176   : > { %v2262_v5 = vadd.f32 %v426_v1, %v316_v61  ;;  %v2264_v6 = vadd.f32 %v479_v3, %v324_v58  ;;  %v474_v1 = vadd.f32 %v473_v57, %v320_v55  ;;  %v423_v3 = vadd.f32 %v422_v59, %v316_v61 }
 0x17a   : > { %v430_v7 = vpop.f32.mrb[4].mxu0  ;;  %v483_v8 = vpop.f32.mrb[4].mxu1 }
 0x17b   : > { %v2266_v9 = vadd.f32 %v430_v7, %v312_v54  ;;  %v432_v10 = vpop.f32.mrb[5].mxu0  ;;  %v2268_v11 = vadd.f32 %v483_v8, %v320_v55  ;;  %v485_v30 = vpop.f32.mrb[5].mxu1  ;;  %v476_v7 = vadd.f32 %v475_v60, %v324_v58  ;;  %v560_v60 = vld [vmem:[#allocation12 + $0x8] sm:$0xff] }
 0x17c   : > { %v2270_v45 = vadd.f32 %v432_v10, %v316_v61  ;;  %v434_v46 = vpop.f32.mrb[6].mxu0  ;;  %v2272_v47 = vadd.f32 %v485_v30, %v324_v58  ;;  %v487_v48 = vpop.f32.mrb[6].mxu1 }
 0x17d   : > { %2472 = vst [vmem:[#allocation19_spill] sm:$0xff] %v2266_v9  ;;  %2473 = vst [vmem:[#allocation20_spill] sm:$0xff] %v2268_v11  ;;  %v2274_v49 = vadd.f32 %v434_v46, %v312_v54  ;;  %v436_v50 = vpop.f32.mrb[7].mxu0  ;;  %v2276_v51 = vadd.f32 %v487_v48, %v320_v55  ;;  %v489_v52 = vpop.f32.mrb[7].mxu1 }
 0x17e   : > { %2474 = vst [vmem:[#allocation21_spill] sm:$0xff] %v2270_v45  ;;  %2475 = vst [vmem:[#allocation22_spill] sm:$0xff] %v2272_v47  ;;  %v2278_v53 = vadd.f32 %v436_v50, %v316_v61  ;;  %v2280_v62 = vadd.f32 %v489_v52, %v324_v58 }
 0x17f   : > { %2476 = vst [vmem:[#allocation23_spill] sm:$0xff] %v2274_v49  ;;  %2477 = vst [vmem:[#allocation24_spill] sm:$0xff] %v2276_v51 }
 0x180   : > { %2478 = vst [vmem:[#allocation25_spill] sm:$0xff] %v2278_v53 }
 0x192   : > { %v762_v8 = vpop.f32.mrb[8].mxu0  ;;  %v803_v10 = vpop.f32.mrb[8].mxu1 }
 0x193   : > { %v810_v4 = vadd.f32 %v762_v8, %v421_v63  ;;  %v812_v30 = vadd.f32 %v803_v10, %v474_v1  ;;  %v764_v47 = vpop.f32.mrb[9].mxu0  ;;  %v805_v45 = vpop.f32.mrb[9].mxu1  ;;  %v2479_v1 = vmov 0  }
 0x194   : > { %v811_v46 = vadd.f32 %v764_v47, %v423_v3  ;;  %v813_v49 = vadd.f32 %v805_v45, %v476_v7  ;;  %v766_v11 = vpop.f32.mrb[10].mxu0  ;;  %v807_v48 = vpop.f32.mrb[10].mxu1 }
 0x195   : > { %v814_v51 = vmul.f32 0.5, %v810_v4  ;;  %v767_v9 = vpop.f32.mrb[11].mxu0  ;;  %v808_v50 = vpop.f32.mrb[11].mxu1 }
 0x196   : > { %v815_v53 = vmul.f32 0.5, %v811_v46  ;;  %v817_v54 = vmul.f32 0.5, %v813_v49 }
 0x197   : > { %1595 = vtanh.f32 %v814_v51 }
 0x198   : > { %1597 = vtanh.f32 %v815_v53 }
 0x199   : > { %1599 = vtanh.f32 %v812_v30 }
 0x19a   : > { %1601 = vtanh.f32 %v817_v54 }
 0x1a1   : > { %v1596_v55 = vpop.eup %1595 }
 0x1a2   : > { %v1598_v56 = vpop.eup %1597  ;;  %v826_v57 = vmul.f32 0.5, %v1596_v55 }
 0x1a3   : > { %v827_v58 = vmul.f32 0.5, %v1598_v56  ;;  %v1600_v61 = vpop.eup %1599 }
 0x1a4   : > { %v830_v59 = vadd.f32 0.5, %v826_v57  ;;  %v1602_v9 = vpop.eup %1601 }
 0x1a5   : > { %v831_v45 = vadd.f32 0.5, %v827_v58  ;;  %v829_v51 = vmul.f32 0.5, %v1602_v9 }
 0x1a6   : > { %v839_v11 = vmul.f32 %v1600_v61, %v830_v59 }
 0x1a7   : > { %v838_v47 = vmul.f32 %v831_v45, %v560_v60  ;;  %v833_v52 = vadd.f32 0.5, %v829_v51 }
 0x1a9   : > { %v2282_v4 = vadd.f32 %v839_v11, %v838_v47 }
 0x1ab   : > { %1603 = vtanh.f32 %v2282_v4 }
 0x1b5   : > { %v1604_v49 = vpop.eup %1603 }
 0x1b6   : > { %v842_v53 = vmul.f32 %v1604_v49, %v833_v52 }
 0x1b8   : > { %843 = vst [vmem:[%s2110_s27] sm:$0xff] %v842_v53  ;;  %v844_v63 = vpack.c.bf16 %v842_v53, %v842_v53 }
 0x1ba   : > { %885 = vmatmul.mubr.bf16.vlgmr.msra.gmra.mrb[12].mxu0 %v844_v63  ;;  %926 = vmatmul.mubr.bf16.vlgmr.msra.gmra.mrb[12].mxu1 %v844_v63 }
 0x1bb   : > { %978 = vmatpush1.bf16.msra.mxu0 %v2121_v14  ;;  %1019 = vmatpush1.bf16.msra.mxu1 %v2123_v15 }
 0x1bc   : > { %979 = vmatprep.subr.bf16.mxu0 %v2126_v16  ;;  %1020 = vmatprep.subr.bf16.mxu1 %v2129_v17 }
 0x1bd   : > { %1009 = vmatprep.mubr.bf16.mxu0 %v2479_v1  ;;  %1050 = vmatprep.mubr.bf16.mxu1 %v2479_v1 }
 0x1bf   : > { %980 = vmatpush1.bf16.msra.mxu0 %v2133_v18  ;;  %1021 = vmatpush1.bf16.msra.mxu1 %v2137_v19 }
 0x1c0   : > { %981 = vmatprep.subr.bf16.mxu0 %v2141_v20  ;;  %1022 = vmatprep.subr.bf16.mxu1 %v2143_v21 }
 0x1c3   : > { %982 = vmatpush1.bf16.msra.mxu0 %v2149_v22  ;;  %1023 = vmatpush1.bf16.msra.mxu1 %v2151_v23 }
 0x1c4   : > { %983 = vmatprep.subr.bf16.mxu0 %v2153_v24  ;;  %1024 = vmatprep.subr.bf16.mxu1 %v2157_v25 }
 0x1c7   : > { %984 = vmatpush1.bf16.msra.mxu0 %v2159_v26  ;;  %1025 = vmatpush1.bf16.msra.mxu1 %v2161_v27 }
 0x1c8   : > { %985 = vmatprep.subr.bf16.mxu0 %v2165_v28  ;;  %1026 = vmatprep.subr.bf16.mxu1 %v2169_v29 }
 0x1cb   : > { %986 = vmatpush1.bf16.msra.mxu0 %v2172_v31  ;;  %1027 = vmatpush1.bf16.msra.mxu1 %v2176_v32 }
 0x1cc   : > { %987 = vmatprep.subr.bf16.mxu0 %v2180_v33  ;;  %1028 = vmatprep.subr.bf16.mxu1 %v2182_v34 }
 0x1cf   : > { %988 = vmatpush1.bf16.msra.mxu0 %v2190_v35  ;;  %1029 = vmatpush1.bf16.msra.mxu1 %v2192_v36 }
 0x1d0   : > { %989 = vmatprep.subr.bf16.mxu0 %v2196_v37  ;;  %1030 = vmatprep.subr.bf16.mxu1 %v2198_v38 }
 0x1d3   : > { %990 = vmatpush1.bf16.msra.mxu0 %v2202_v39  ;;  %1031 = vmatpush1.bf16.msra.mxu1 %v2204_v40 }
 0x1d4   : > { %991 = vmatprep.subr.bf16.mxu0 %v2208_v41  ;;  %1032 = vmatprep.subr.bf16.mxu1 %v2210_v42 }
 0x1d7   : > { %992 = vmatpush1.bf16.msra.mxu0 %v2214_v43  ;;  %1033 = vmatpush1.bf16.msra.mxu1 %v2216_v44 }
 0x1d8   : > { %1102 = vmatprep.subr.bf16.mxu0 %v2117_v12  ;;  %1143 = vmatprep.subr.bf16.mxu1 %v2119_v13 }
 0x28d   : > { %v886_v3 = vpop.f32.mrb[12].mxu0  ;;  %v927_v7 = vpop.f32.mrb[12].mxu1 }
 0x28e   : > { %v934_v8 = vadd.f32 %v886_v3, %v2258_v0  ;;  %v936_v10 = vadd.f32 %v927_v7, %v2260_v2  ;;  %v888_v30 = vpop.f32.mrb[13].mxu0  ;;  %v929_v46 = vpop.f32.mrb[13].mxu1 }
 0x28f   : > { %v935_v48 = vadd.f32 %v888_v30, %v2262_v5  ;;  %v937_v50 = vadd.f32 %v929_v46, %v2264_v6  ;;  %v890_v54 = vpop.f32.mrb[14].mxu0  ;;  %v931_v55 = vpop.f32.mrb[14].mxu1  ;;  %v2484_v46 = vld [vmem:[#allocation23_spill] sm:$0xff] }
 0x290   : > { %v938_v56 = vmul.f32 0.5, %v934_v8  ;;  %v891_v57 = vpop.f32.mrb[15].mxu0  ;;  %v932_v58 = vpop.f32.mrb[15].mxu1 }
 0x291   : > { %v939_v12 = vmul.f32 0.5, %v935_v48  ;;  %v941_v13 = vmul.f32 0.5, %v937_v50  ;;  %v2485_v50 = vld [vmem:[#allocation24_spill] sm:$0xff]  ;;  %v2486_v57 = vld [vmem:[#allocation25_spill] sm:$0xff] }
 0x292   : > { %1605 = vtanh.f32 %v938_v56 }
 0x293   : > { %1607 = vtanh.f32 %v939_v12 }
 0x294   : > { %1609 = vtanh.f32 %v936_v10 }
 0x295   : > { %1611 = vtanh.f32 %v941_v13 }
 0x29c   : > { %v1606_v59 = vpop.eup %1605 }
 0x29d   : > { %v1608_v0 = vpop.eup %1607  ;;  %v950_v2 = vmul.f32 0.5, %v1606_v59 }
 0x29e   : > { %v951_v60 = vmul.f32 0.5, %v1608_v0  ;;  %v1610_v5 = vpop.eup %1609 }
 0x29f   : > { %v954_v61 = vadd.f32 0.5, %v950_v2  ;;  %v1612_v9 = vpop.eup %1611 }
 0x2a0   : > { %v955_v45 = vadd.f32 0.5, %v951_v60  ;;  %v953_v51 = vmul.f32 0.5, %v1612_v9 }
 0x2a1   : > { %v963_v6 = vmul.f32 %v1610_v5, %v954_v61 }
 0x2a2   : > { %v962_v11 = vmul.f32 %v955_v45, %v2282_v4  ;;  %v957_v52 = vadd.f32 0.5, %v953_v51 }
 0x2a4   : > { %v2325_v47 = vadd.f32 %v963_v6, %v962_v11 }
 0x2a6   : > { %1613 = vtanh.f32 %v2325_v47 }
 0x2b0   : > { %v1614_v49 = vpop.eup %1613 }
 0x2b1   : > { %v966_v53 = vmul.f32 %v1614_v49, %v957_v52 }
 0x2b3   : > { %1427 = vst [vmem:[%s2110_s27 + $0x8] sm:$0xff] %v966_v53  ;;  %v969_v63 = vpack.c.bf16 %v966_v53, %v966_v53 }
 0x2b5   : > { %1010 = vmatmul.mubr.bf16.vlgmr.msra.gmra.mrb[16].mxu0 %v969_v63  ;;  %1051 = vmatmul.mubr.bf16.vlgmr.msra.gmra.mrb[16].mxu1 %v969_v63 }
 0x2b6   : > { %1103 = vmatpush1.bf16.msra.mxu0 %v2121_v14  ;;  %1144 = vmatpush1.bf16.msra.mxu1 %v2123_v15 }
 0x2b7   : > { %1104 = vmatprep.subr.bf16.mxu0 %v2126_v16  ;;  %1145 = vmatprep.subr.bf16.mxu1 %v2129_v17  ;;  %v2480_v16 = vld [vmem:[#allocation19_spill] sm:$0xff] }
 0x2b8   : > { %1134 = vmatprep.mubr.bf16.mxu0 %v2479_v1  ;;  %1175 = vmatprep.mubr.bf16.mxu1 %v2479_v1 }
 0x2ba   : > { %1105 = vmatpush1.bf16.msra.mxu0 %v2133_v18  ;;  %1146 = vmatpush1.bf16.msra.mxu1 %v2137_v19  ;;  %v2481_v18 = vld [vmem:[#allocation20_spill] sm:$0xff] }
 0x2bb   : > { %1106 = vmatprep.subr.bf16.mxu0 %v2141_v20  ;;  %1147 = vmatprep.subr.bf16.mxu1 %v2143_v21 }
 0x2be   : > { %1107 = vmatpush1.bf16.msra.mxu0 %v2149_v22  ;;  %1148 = vmatpush1.bf16.msra.mxu1 %v2151_v23  ;;  %v2482_v22 = vld [vmem:[#allocation21_spill] sm:$0xff] }
 0x2bf   : > { %1108 = vmatprep.subr.bf16.mxu0 %v2153_v24  ;;  %1149 = vmatprep.subr.bf16.mxu1 %v2157_v25  ;;  %v2483_v24 = vld [vmem:[#allocation22_spill] sm:$0xff] }
 0x2c2   : > { %1109 = vmatpush1.bf16.msra.mxu0 %v2159_v26  ;;  %1150 = vmatpush1.bf16.msra.mxu1 %v2161_v27 }
 0x2c3   : > { %1110 = vmatprep.subr.bf16.mxu0 %v2165_v28  ;;  %1151 = vmatprep.subr.bf16.mxu1 %v2169_v29 }
 0x2c6   : > { %1111 = vmatpush1.bf16.msra.mxu0 %v2172_v31  ;;  %1152 = vmatpush1.bf16.msra.mxu1 %v2176_v32 }
 0x2c7   : > { %1112 = vmatprep.subr.bf16.mxu0 %v2180_v33  ;;  %1153 = vmatprep.subr.bf16.mxu1 %v2182_v34 }
 0x2ca   : > { %1113 = vmatpush1.bf16.msra.mxu0 %v2190_v35  ;;  %1154 = vmatpush1.bf16.msra.mxu1 %v2192_v36 }
 0x2cb   : > { %1114 = vmatprep.subr.bf16.mxu0 %v2196_v37  ;;  %1155 = vmatprep.subr.bf16.mxu1 %v2198_v38 }
 0x2ce   : > { %1115 = vmatpush1.bf16.msra.mxu0 %v2202_v39  ;;  %1156 = vmatpush1.bf16.msra.mxu1 %v2204_v40 }
 0x2cf   : > { %1116 = vmatprep.subr.bf16.mxu0 %v2208_v41  ;;  %1157 = vmatprep.subr.bf16.mxu1 %v2210_v42 }
 0x2d2   : > { %1117 = vmatpush1.bf16.msra.mxu0 %v2214_v43  ;;  %1158 = vmatpush1.bf16.msra.mxu1 %v2216_v44 }
 0x388   : > { %v1011_v14 = vpop.f32.mrb[16].mxu0  ;;  %v1052_v15 = vpop.f32.mrb[16].mxu1 }
 0x389   : > { %v1059_v17 = vadd.f32 %v1011_v14, %v2480_v16  ;;  %v1061_v19 = vadd.f32 %v1052_v15, %v2481_v18  ;;  %v1013_v20 = vpop.f32.mrb[17].mxu0  ;;  %v1054_v21 = vpop.f32.mrb[17].mxu1 }
 0x38a   : > { %v1060_v23 = vadd.f32 %v1013_v20, %v2482_v22  ;;  %v1062_v25 = vadd.f32 %v1054_v21, %v2483_v24  ;;  %v1015_v26 = vpop.f32.mrb[18].mxu0  ;;  %v1056_v27 = vpop.f32.mrb[18].mxu1 }
 0x38b   : > { %v1063_v28 = vmul.f32 0.5, %v1059_v17  ;;  %v1016_v29 = vpop.f32.mrb[19].mxu0  ;;  %v1057_v31 = vpop.f32.mrb[19].mxu1 }
 0x38c   : > { %v1064_v32 = vmul.f32 0.5, %v1060_v23  ;;  %v1066_v33 = vmul.f32 0.5, %v1062_v25 }
 0x38d   : > { %1615 = vtanh.f32 %v1063_v28 }
 0x38e   : > { %1617 = vtanh.f32 %v1064_v32 }
 0x38f   : > { %1619 = vtanh.f32 %v1061_v19 }
 0x390   : > { %1621 = vtanh.f32 %v1066_v33 }
 0x397   : > { %v1616_v34 = vpop.eup %1615 }
 0x398   : > { %v1618_v35 = vpop.eup %1617  ;;  %v1075_v36 = vmul.f32 0.5, %v1616_v34 }
 0x399   : > { %v1076_v37 = vmul.f32 0.5, %v1618_v35  ;;  %v1620_v39 = vpop.eup %1619 }
 0x39a   : > { %v1079_v38 = vadd.f32 0.5, %v1075_v36  ;;  %v1622_v44 = vpop.eup %1621 }
 0x39b   : > { %v1080_v40 = vadd.f32 0.5, %v1076_v37  ;;  %v1078_v4 = vmul.f32 0.5, %v1622_v44 }
 0x39c   : > { %v1088_v41 = vmul.f32 %v1620_v39, %v1079_v38 }
 0x39d   : > { %v1087_v42 = vmul.f32 %v1080_v40, %v2325_v47  ;;  %v1082_v1 = vadd.f32 0.5, %v1078_v4 }
 0x39f   : > { %v1089_v43 = vadd.f32 %v1088_v41, %v1087_v42 }
 0x3a1   : > { %1623 = vtanh.f32 %v1089_v43 }
 0x3ab   : > { %v1624_v3 = vpop.eup %1623 }
 0x3ac   : > { %v1091_v7 = vmul.f32 %v1624_v3, %v1082_v1 }
 0x3ae   : > { %1428 = vst [vmem:[%s2110_s27 + $0x10] sm:$0xff] %v1091_v7  ;;  %v1094_v8 = vpack.c.bf16 %v1091_v7, %v1091_v7 }
 0x3b0   : > { %1135 = vmatmul.mubr.bf16.vlgmr.msra.gmra.mrb[20].mxu0 %v1094_v8  ;;  %1176 = vmatmul.mubr.bf16.vlgmr.msra.gmra.mrb[20].mxu1 %v1094_v8 }
 0x483   : > { %v1136_v10 = vpop.f32.mrb[20].mxu0  ;;  %v1177_v30 = vpop.f32.mrb[20].mxu1 }
 0x484   : > { %v1184_v48 = vadd.f32 %v1136_v10, %v2484_v46  ;;  %v1186_v54 = vadd.f32 %v1177_v30, %v2485_v50  ;;  %v1138_v55 = vpop.f32.mrb[21].mxu0  ;;  %v1179_v56 = vpop.f32.mrb[21].mxu1 }
 0x485   : > { %v1185_v58 = vadd.f32 %v1138_v55, %v2486_v57  ;;  %v1187_v12 = vadd.f32 %v1179_v56, %v2280_v62  ;;  %v1140_v13 = vpop.f32.mrb[22].mxu0  ;;  %v1181_v59 = vpop.f32.mrb[22].mxu1 }
 0x486   : > { %v1188_v0 = vmul.f32 0.5, %v1184_v48  ;;  %v1141_v2 = vpop.f32.mrb[23].mxu0  ;;  %v1182_v60 = vpop.f32.mrb[23].mxu1 }
 0x487   : > { %v1189_v61 = vmul.f32 0.5, %v1185_v58  ;;  %v1191_v5 = vmul.f32 0.5, %v1187_v12 }
 0x488   : > { %1625 = vtanh.f32 %v1188_v0 }
 0x489   : > { %1627 = vtanh.f32 %v1189_v61 }
 0x48a   : > { %1629 = vtanh.f32 %v1186_v54 }
 0x48b   : > { %1631 = vtanh.f32 %v1191_v5 }
 0x492   : > { %v1626_v45 = vpop.eup %1625 }
 0x493   : > { %v1628_v6 = vpop.eup %1627  ;;  %v1200_v11 = vmul.f32 0.5, %v1626_v45 }
 0x494   : > { %v1201_v47 = vmul.f32 0.5, %v1628_v6  ;;  %v1630_v51 = vpop.eup %1629 }
 0x495   : > { %v1204_v9 = vadd.f32 0.5, %v1200_v11  ;;  %v1632_v63 = vpop.eup %1631 }
 0x496   : > { %v1205_v62 = vadd.f32 0.5, %v1201_v47  ;;  %v1203_v14 = vmul.f32 0.5, %v1632_v63 }
 0x497   : > { %v1213_v52 = vmul.f32 %v1630_v51, %v1204_v9 }
 0x498   : > { %v1212_v49 = vmul.f32 %v1205_v62, %v1089_v43  ;;  %v1207_v15 = vadd.f32 0.5, %v1203_v14 }
 0x49a   : > { %v1214_v53 = vadd.f32 %v1213_v52, %v1212_v49 }
 0x49c   : > { %1633 = vtanh.f32 %v1214_v53  ;;  %1221 = vst [vmem:[#allocation12 + $0x8] sm:$0xff] %v1214_v53 }
 0x4a6   : > { %v1634_v16 = vpop.eup %1633 }
 0x4a7   : > { %v1216_v17 = vmul.f32 %v1634_v16, %v1207_v15 }
 0x4a9   : > { %1429 = vst [vmem:[%s2110_s27 + $0x18] sm:$0xff] %v1216_v17 }
 0x4aa   : > { %1762 = shalt.err (!%p1759_p10)
}
 0x4ab   : > { %s1763_s16 = scalar_lea.hbm %s2376_s23, 512  ;;  %s1767_s26 = scalar_lea.hbm %s2450_s4, 1024 }
 0x4ac   : > { %p1764_p3 = scmp.ne.s32.totalorder %s2376_s23, %s1763_s16  ;;  %p1768_p0 = scmp.lt.u32.totalorder %s2376_s23, %s2450_s4 }
 0x4ad   : > { %p1769_p6 = scmp.lt.u32.totalorder %s1767_s26, %s1763_s16  ;;  %p1771_p11 = scmp.lt.u32.totalorder %s1763_s16, %s2376_s23 }
 0x4ae   : > { %p1765_p12 = pnand %p1764_p3, %p2043_p5 }
 0x4af   : > { %p1770_p8 = por %p1769_p6, %p1768_p0 }
 0x4b0   : > { %p1766_p9 = pneg %p1765_p12 }
 0x4b1   : > { %p1772_p7 = por %p1771_p11, %p1770_p8 }
 0x4b3   : > { %p1773_p13 = pnand %p1772_p7, %p1766_p9 }
 0x4b5   : > { %1776 = shalt.err (!%p1773_p13)
}
 0x4b6   : > { %s1867_s6 = smov 128   ;;  %s1868_s10 = smov 8   ;;  %v1430_v18 = vld [vmem:[%s2110_s27 + $0x18] sm:$0xff] }
 0x4b7   : > { %1454 = dma.vmem_to_hbm [thread:$0]  (%p2043_p5), %s2378_s13, 512, %s2376_s23, %s1223_s9, %s1867_s6, %s1867_s6, %s1868_s10   ;;  %1220 = vst [vmem:[#allocation12] sm:$0xff] %v1430_v18 }
 0x4b8   : > { %s1869_s11 = smov [#allocation12]   ;;  %p2487_p1 = scmp.eq.s32.totalorder %s1921_s22, 1 }
 0x4b9   : > { %s1249_s14 = sshll.u32 %s1869_s11, 4  ;;  %s1250_s14 = int_to_ptr.vmem [resolvable:$true] %s1249_s14 }
 0x4ba   : > { %s1777_s15 = scalar_lea.vmem %s1250_s14, 256  ;;  %p1784_p3 = scmp.lt.s32.totalorder %s1250_s14, %s1250_s14 }
 0x4bb   : > { %p1778_p2 = scmp.ne.s32.totalorder %s1250_s14, %s1777_s15  ;;  %p1785_p12 = scmp.lt.s32.totalorder %s1777_s15, %s1777_s15 }
 0x4bd   : > { %p1779_p4 = pnand %p1778_p2, %p2487_p1  ;;  %p1786_p9 = por %p1785_p12, %p1784_p3 }
 0x4bf   : > { %p1780_p10 = pneg %p1779_p4 }
 0x4c1   : > { %p1787_p0 = pnand %p1786_p9, %p1780_p10 }
 0x4c3   : > { %1790 = shalt.err (!%p1787_p0)
}
 0x4c4   : > { %s1791_s17 = scalar_lea.hbm %s2451_s5, 256  ;;  %p2488_p6 = pmov %p2487_p1 }
 0x4c5   : > { %p1792_p5 = scmp.ne.s32.totalorder %s2451_s5, %s1791_s17  ;;  %p1797_p7 = scmp.lt.u32.totalorder %s1791_s17, %s2451_s5 }
 0x4c7   : > { %p1793_p8 = pnand %p1792_p5, %p2488_p6 }
 0x4c9   : > { %p1794_p11 = pneg %p1793_p8 }
 0x4cb   : > { %p1799_p13 = pnand %p1797_p7, %p1794_p11 }
 0x4cd   : > { %1802 = shalt.err (!%p1799_p13)
}
 0x4ce   : > { %p2489_p2 = pmov %p2487_p1 }
 0x4d0   : > { %1456 = dma.vmem_to_hbm [thread:$0]  (%p2489_p2), %s1250_s14, 256, %s2451_s5, [#allocation13], %s1867_s6, %s1867_s6, %s1868_s10  }
 0x4d1   : > { %1832 = dma.done.wait (%p2487_p1), [#allocation13], 256   ;;  %p2490_p4 = pmov %p2487_p1 }
 0x4d3   : > { %1834 = vsyncadd (%p2490_p4), [#allocation13], 4294967040 }
 0x4d4 PF: > { %s1268_s26 = sand.u32 1, %s1841_s18   ;;  %p2491_p10 = scmp.ne.s32.totalorder %s2458_s25, 0 }
 0x4d5   : > { %p2492_p3 = scmp.ge.s32.totalorder %s1853_s21, 2  ;;  %s1269_s24 = scalar_lea.sflag [#allocation5], %s1268_s26 }
 0x4d7   : > { %p1475_p12 = pnand %p2492_p3, %p2491_p10 }
 0x4d9   : > { %1836 = dma.done.wait (!%p1475_p12), %s1269_s24, 512  }
 0x4da   : > { %1838 = vsyncadd (!%p1475_p12), %s1269_s24, 4294966784  ;;  %p22_p9 = scmp.ge.s32.totalorder %s2011_s30, 4   ;;  %s2493_s18 = smov %s1845_s19 }
 0x4db   : > { %s2494_s19 = smov %s1849_s20  ;;  %s2495_s20 = smov %s2039_s29 }
 0x4dc   : > { %s2496_s21 = smov %s2011_s30  ;;  %24 = sbr.rel (!%p22_p9) target bundleno = 8 (0x8), region = 113 }
 0x4e3   :  { %1274 = vsyncpa [#allocation4], 1 }
 0x4e4   :  { %1276 = vsyncpa [#allocation4 + $0x1], 1 }
 0x4e5   :  { %1277 = vsyncpa [#allocation7], 1 }
 0x4e6   :  { %1278 = vsyncpa [#allocation10], 1 }
 0x4e7   :  { %1279 = vsyncpa [#allocation5], 1 }
 0x4e8   :  { %1281 = vsyncpa [#allocation5 + $0x1], 1 }
 0x4e9   :  { %1282 = vsyncpa [#allocation13], 1 }

</bundles_post_ra>
